<compile_context>
chip_gen: v7x
topology: tpu7x:2x2x1
jax: 0.10.0
libtpu: 0.0.40
codegen_flags: <defaults>
</compile_context>

<pallas_src>
import functools
import math

import jax
import jax.numpy as jnp
import numpy as np
from jax.experimental import pallas as pl
from jax.experimental.pallas import tpu as pltpu

EPS = 1e-5
NEG_INF = -1e30               # large finite constant; keeps the exp path NaN-free
GELU_APPROX_TANH = False      # False = exact erf GELU (PyTorch nn.GELU() default)
# Scoped VMEM limit: below v7x's 64 MiB physical, comfortable headroom on
# v5e/v6e (128 MiB physical).
VMEM_LIMIT_BYTES = 48 * 1024 * 1024

_SQRT_HALF = 0.7071067811865476


def _pick_tile(T, max_tile=256):
    """Largest tile <= max_tile that divides T and is a multiple of 8; else full T."""
    for cand in (256, 128, 64, 32, 16, 8):
        if cand <= max_tile and cand <= T and T % cand == 0:
            return cand
    return T


def _layernorm(x, g):
    # x: (t, C) f32, g: (C,) f32 -- no bias (config.bias=False)
    mu = jnp.mean(x, axis=-1, keepdims=True)
    var = jnp.mean((x - mu) ** 2, axis=-1, keepdims=True)
    return (x - mu) * jax.lax.rsqrt(var + EPS) * g


def _erf_poly(x):
    # Abramowitz & Stegun 7.1.26 (|err| <= 1.5e-7): exact-GELU semantics built
    # only from exp / mul / add / select (no reliance on an erf_p lowering).
    a1, a2, a3, a4, a5 = (0.254829592, -0.284496736, 1.421413741,
                          -1.453152027, 1.061405429)
    p = 0.3275911
    ax = jnp.abs(x)
    t = 1.0 / (1.0 + p * ax)
    poly = ((((a5 * t + a4) * t + a3) * t + a2) * t + a1) * t
    y = 1.0 - poly * jnp.exp(-ax * ax)
    return jnp.where(x < 0.0, -y, y)


def _gelu(x):
    if GELU_APPROX_TANH:
        return jax.nn.gelu(x, approximate=True)   # single EUP tanh per element
    return 0.5 * x * (1.0 + _erf_poly(x * _SQRT_HALF))


def _weight_spec(shape, index_map):
    """Resident weight block: constant index_map, so single-buffer it (saves
    VMEM; double-buffering a block that never changes buys nothing)."""
    try:
        return pl.BlockSpec(shape, index_map,
                            pipeline_mode=pl.Buffered(buffer_count=1))
    except TypeError:  # older BlockSpec signature without pipeline_mode
        return pl.BlockSpec(shape, index_map)


# ---------------------------------------------------------------------------
# Kernel 1: LN1 + fused QKV projection  ->  head-major q/k/v (B, H, T, hd) bf16
# ---------------------------------------------------------------------------
def ln_qkv_kernel(x_ref, g1_ref, wqkv_ref, q_ref, k_ref, v_ref, *, n_head):
    x = x_ref[0]                          # (tile, C) f32
    g1 = g1_ref[0]                        # (C,)     f32
    C = x.shape[-1]
    hd = C // n_head

    xn = _layernorm(x, g1).astype(jnp.bfloat16)
    # One fat MXU matmul (K=C, N=3C) with f32 accumulation.  The Q columns of
    # wqkv are pre-scaled by 1/sqrt(hd) in the wrapper.
    qkv = jnp.dot(xn, wqkv_ref[...],
                  preferred_element_type=jnp.float32).astype(jnp.bfloat16)

    # Head-major writeback, once per token tile (outside the attention hot
    # loop).  Destination lane width is hd (<128 for GPT-2-class models), so
    # stores are masked regardless of how the slab is assembled in registers.
    for h in range(n_head):
        q_ref[0, h] = qkv[:, h * hd:(h + 1) * hd]
        k_ref[0, h] = qkv[:, C + h * hd:C + (h + 1) * hd]
        v_ref[0, h] = qkv[:, 2 * C + h * hd:2 * C + (h + 1) * hd]


# ---------------------------------------------------------------------------
# Kernel 2: flash attention, K/V resident per batch, in-kernel KV loop
# ---------------------------------------------------------------------------
def flash_attn_kernel(q_ref, k_ref, v_ref, o_ref, m_sc, l_sc, acc_sc,
                      *, n_head, tile):
    qi = pl.program_id(1)

    m_sc[...] = jnp.full(m_sc.shape, NEG_INF, dtype=jnp.float32)
    l_sc[...] = jnp.zeros(l_sc.shape, dtype=jnp.float32)
    acc_sc[...] = jnp.zeros(acc_sc.shape, dtype=jnp.float32)

    def attend(kv_start, masked):
        q3 = q_ref[0]                                   # (H, tq, hd) bf16, pre-scaled
        k3 = k_ref[0, :, pl.ds(kv_start, tile), :]      # (H, tk, hd) bf16
        v3 = v_ref[0, :, pl.ds(kv_start, tile), :]      # (H, tk, hd) bf16

        # Heads batched on the MXU, f32 accumulation.
        s = jnp.einsum('hqd,hkd->hqk', q3, k3,
                       preferred_element_type=jnp.float32)     # (H, tq, tk)
        if masked:
            # Only the diagonal KV tile needs a causal mask; tq == tk so the
            # global offsets cancel and a local iota compare suffices.
            rows = jax.lax.broadcasted_iota(jnp.int32, (tile, tile), 0)
            cols = jax.lax.broadcasted_iota(jnp.int32, (tile, tile), 1)
            s = jnp.where((rows >= cols)[None, :, :], s, NEG_INF)

        m_prev = m_sc[...]
        m_new = jnp.maximum(m_prev, jnp.max(s, axis=-1, keepdims=True))
        alpha = jnp.exp(m_prev - m_new)
        p = jnp.exp(s - m_new)                                 # (H, tq, tk) f32
        l_sc[...] = alpha * l_sc[...] + jnp.sum(p, axis=-1, keepdims=True)
        acc_sc[...] = alpha * acc_sc[...] + jnp.einsum(
            'hqk,hkd->hqd', p.astype(jnp.bfloat16), v3,
            preferred_element_type=jnp.float32)
        m_sc[...] = m_new

    # Fully-visible KV tiles strictly below the diagonal: no mask work, and
    # causally-dead tiles are never touched (no compute, no DMA -- K/V for the
    # whole sequence was fetched once per batch element by the BlockSpec).
    def below_diag(j, carry):
        attend(pl.multiple_of(j * tile, tile), masked=False)
        return carry
    jax.lax.fori_loop(0, qi, below_diag, 0)

    # Diagonal tile with the causal mask.
    attend(pl.multiple_of(qi * tile, tile), masked=True)

    inv_l = pl.reciprocal(l_sc[...], approx=True)              # EUP slot, ~free
    y = acc_sc[...] * inv_l                                    # (H, tq, hd) f32
    hd = y.shape[-1]
    # Token-major (tq, C) output block (lane-dense HBM-facing out_spec) so the
    # projection matmul in kernel 3 is a single fat K=C contraction.
    for h in range(n_head):
        o_ref[0, :, h * hd:(h + 1) * hd] = y[h].astype(o_ref.dtype)


# ---------------------------------------------------------------------------
# Kernel 3: attn out-proj + residual, then LN2 + MLP(GELU) + residual (fused)
# ---------------------------------------------------------------------------
def proj_mlp_kernel(x_ref, y_ref, g2_ref, wproj_ref, wfc_ref, wpr_ref, o_ref):
    x = x_ref[0]                          # (tile, C) f32 (pre-attention residual)
    y = y_ref[0]                          # (tile, C) bf16 (attention output, pre-proj)
    g2 = g2_ref[0]                        # (C,)

    attn = jnp.dot(y, wproj_ref[...], preferred_element_type=jnp.float32)
    x1 = x + attn                         # residual #1 (never leaves VMEM)

    xn = _layernorm(x1, g2).astype(jnp.bfloat16)
    h = jnp.dot(xn, wfc_ref[...], preferred_element_type=jnp.float32)   # (tile, 4C)
    h = _gelu(h)                                                        # f32
    y2 = jnp.dot(h.astype(jnp.bfloat16), wpr_ref[...],
                 preferred_element_type=jnp.float32)                    # (tile, C)
    o_ref[0] = x1 + y2                    # residual #2 (dropout = 0 in eval)


# ---------------------------------------------------------------------------
# Wrapper
# ---------------------------------------------------------------------------
def block_forward(x, params, n_head, *, max_tile=256):
    B, T, C = x.shape
    assert C % n_head == 0
    hd = C // n_head
    tile = _pick_tile(T, max_tile)
    nT = T // tile
    bf = jnp.bfloat16

    g1 = params["ln1_w"].reshape(1, C).astype(jnp.float32)
    g2 = params["ln2_w"].reshape(1, C).astype(jnp.float32)

    # Fold the 1/sqrt(hd) attention scale into the Q columns of the fused QKV
    # weight (one XLA-side multiply; removes a per-KV-step VPU multiply).
    w_attn = params["w_attn"].astype(jnp.float32)
    scale = 1.0 / math.sqrt(hd)
    wqkv = jnp.concatenate([w_attn[:, :C] * scale, w_attn[:, C:]],
                           axis=1).astype(bf)                 # (C, 3C)
    wproj = params["w_attn_proj"].astype(bf)                  # (C, C)
    wfc = params["w_fc"].astype(bf)                           # (C, 4C)
    wpr = params["w_mlp_proj"].astype(bf)                     # (4C, C)

    x_spec = pl.BlockSpec((1, tile, C), lambda b, i: (b, i, 0))
    vec_spec = pl.BlockSpec((1, C), lambda b, i: (0, 0))

    cp = pltpu.CompilerParams(
        dimension_semantics=("parallel", "parallel"),
        vmem_limit_bytes=VMEM_LIMIT_BYTES)

    # --- Kernel 1: LN1 + QKV projection -> head-major bf16 q/k/v ------------
    qkv_out_spec = pl.BlockSpec((1, n_head, tile, hd), lambda b, i: (b, 0, i, 0))
    q, k, v = pl.pallas_call(
        functools.partial(ln_qkv_kernel, n_head=n_head),
        out_shape=[jax.ShapeDtypeStruct((B, n_head, T, hd), bf)] * 3,
        grid=(B, nT),
        in_specs=[x_spec, vec_spec,
                  _weight_spec((C, 3 * C), lambda b, i: (0, 0))],
        out_specs=[qkv_out_spec] * 3,
        compiler_params=cp,
    )(x, g1, wqkv)

    # --- Kernel 2: flash attention with per-batch-resident K/V --------------
    q_spec = pl.BlockSpec((1, n_head, tile, hd), lambda b, qi: (b, 0, qi, 0))
    # K/V blocks cover the full sequence and their index map ignores qi, so the
    # HBM->VMEM DMA happens exactly once per batch element: no causally-dead
    # tile fetches and no T/tile re-read amplification.
    kv_spec = pl.BlockSpec((1, n_head, T, hd), lambda b, qi: (b, 0, 0, 0))
    y = pl.pallas_call(
        functools.partial(flash_attn_kernel, n_head=n_head, tile=tile),
        out_shape=jax.ShapeDtypeStruct((B, T, C), bf),
        grid=(B, nT),
        in_specs=[q_spec, kv_spec, kv_spec],
        out_specs=pl.BlockSpec((1, tile, C), lambda b, qi: (b, qi, 0)),
        scratch_shapes=[
            pltpu.VMEM((n_head, tile, 1), jnp.float32),   # running max
            pltpu.VMEM((n_head, tile, 1), jnp.float32),   # running denom
            pltpu.VMEM((n_head, tile, hd), jnp.float32),  # output accumulator
        ],
        compiler_params=cp,
    )(q, k, v)

    # --- Kernel 3: attn proj + residual + LN2 + MLP + residual (fused) ------
    # TODO(synk): this could be fused into the attention finalize to save one
    # (B,T,C) bf16 HBM round trip; kept separate to bound VMEM on v7x (64 MiB).
    out = pl.pallas_call(
        proj_mlp_kernel,
        out_shape=jax.ShapeDtypeStruct((B, T, C), jnp.float32),
        grid=(B, nT),
        in_specs=[
            x_spec,                                        # x (f32 residual)
            x_spec,                                        # y (bf16, same tiling)
            vec_spec,
            _weight_spec((C, C), lambda b, i: (0, 0)),
            _weight_spec((C, 4 * C), lambda b, i: (0, 0)),
            _weight_spec((4 * C, C), lambda b, i: (0, 0)),
        ],
        out_specs=x_spec,
        compiler_params=cp,
    )(x, y, g2, wproj, wfc, wpr)

    return out


# ---------------------------------------------------------------------------
# Pure-JAX reference (PyTorch semantics, f32 throughout, for validation)
# ---------------------------------------------------------------------------
def block_ref(x, params, n_head):
    B, T, C = x.shape
    hd = C // n_head

    def ln(v, g):
        mu = jnp.mean(v, axis=-1, keepdims=True)
        var = jnp.mean((v - mu) ** 2, axis=-1, keepdims=True)
        return (v - mu) * jax.lax.rsqrt(var + EPS) * g

    xn = ln(x, params["ln1_w"])
    qkv = jnp.einsum("btc,cd->btd", xn, params["w_attn"])
    q, k, v = jnp.split(qkv, 3, axis=-1)
    q = q.reshape(B, T, n_head, hd).transpose(0, 2, 1, 3)
    k = k.reshape(B, T, n_head, hd).transpose(0, 2, 1, 3)
    v = v.reshape(B, T, n_head, hd).transpose(0, 2, 1, 3)
    s = jnp.einsum("bhqd,bhkd->bhqk", q, k) / math.sqrt(hd)
    mask = jnp.tril(jnp.ones((T, T), dtype=bool))
    s = jnp.where(mask, s, -jnp.inf)
    p = jax.nn.softmax(s, axis=-1)
    y = jnp.einsum("bhqk,bhkd->bhqd", p, v)
    y = y.transpose(0, 2, 1, 3).reshape(B, T, C)
    y = jnp.einsum("btc,cd->btd", y, params["w_attn_proj"])
    x = x + y

    xn = ln(x, params["ln2_w"])
    h = jnp.einsum("btc,cd->btd", xn, params["w_fc"])
    h = jax.nn.gelu(h, approximate=False)     # exact erf GELU (nn.GELU default)
    y = jnp.einsum("btc,cd->btd", h, params["w_mlp_proj"])
    return x + y


def _make_params(key, C):
    k1, k2, k3, k4, k5, k6 = jax.random.split(key, 6)
    return {
        "ln1_w": 1.0 + 0.1 * jax.random.normal(k5, (C,), jnp.float32),
        "ln2_w": 1.0 + 0.1 * jax.random.normal(k6, (C,), jnp.float32),
        "w_attn": 0.02 * jax.random.normal(k1, (C, 3 * C), jnp.float32),
        "w_attn_proj": 0.02 * jax.random.normal(k2, (C, C), jnp.float32),
        "w_fc": 0.02 * jax.random.normal(k3, (C, 4 * C), jnp.float32),
        "w_mlp_proj": 0.02 * jax.random.normal(k4, (4 * C, C), jnp.float32),
    }


if __name__ == "__main__":
    key = jax.random.PRNGKey(0)
    kp1, kx1, kp2, kx2 = jax.random.split(key, 4)

    # Config 1: tiny, single-tile path (n_embd=32, n_head=4, batch=2, seq=8).
    B, T, C, H = 2, 8, 32, 4
    x = jax.random.normal(kx1, (B, T, C), dtype=jnp.float32)
    params = _make_params(kp1, C)
    out = jax.block_until_ready(block_forward(x, params, H))
    ref = jax.block_until_ready(block_ref(x, params, H))
    np.testing.assert_allclose(np.asarray(out), np.asarray(ref),
                               rtol=2e-2, atol=2e-2)
    assert out.shape == (B, T, C)

    # Config 2: exercises the multi-tile in-kernel KV loop (tiles of 8 over T=32).
    B2, T2, C2, H2 = 2, 32, 128, 4
    x2 = jax.random.normal(kx2, (B2, T2, C2), dtype=jnp.float32)
    params2 = _make_params(kp2, C2)
    out2 = jax.block_until_ready(block_forward(x2, params2, H2, max_tile=8))
    ref2 = jax.block_until_ready(block_ref(x2, params2, H2))
    np.testing.assert_allclose(np.asarray(out2), np.asarray(ref2),
                               rtol=2e-2, atol=2e-2)
    assert out2.shape == (B2, T2, C2)

    print("KERNEL_OK")
</pallas_src>

<mosaic_0001>
module attributes {stable_mosaic.version = 11 : i64} {
  func.func @ln_qkv_kernel(%arg0: i32, %arg1: i32, %arg2: memref<1x8x32xf32, #tpu.memory_space<vmem>>, %arg3: memref<1x32xf32, #tpu.memory_space<vmem>>, %arg4: memref<32x96xbf16, #tpu.memory_space<vmem>>, %arg5: memref<1x4x8x8xbf16, #tpu.memory_space<vmem>>, %arg6: memref<1x4x8x8xbf16, #tpu.memory_space<vmem>>, %arg7: memref<1x4x8x8xbf16, #tpu.memory_space<vmem>>) attributes {dimension_semantics = [#tpu.dimension_semantics<parallel>, #tpu.dimension_semantics<parallel>], iteration_bounds = array<i64: 2, 1>, scalar_prefetch = 0 : i64, scratch_operands = 0 : i64, tpu.core_type = #tpu.core_type<tc>, window_params = [{transform_indices = @transform_0, window_bounds = array<i64: 1, 8, 32>}, {pipeline_mode = #tpu.pipeline_mode<synchronous>, transform_indices = @transform_1, window_bounds = array<i64: 1, 32>}, {pipeline_mode = #tpu.pipeline_mode<synchronous>, transform_indices = @transform_2, window_bounds = array<i64: 32, 96>}, {transform_indices = @transform_3, window_bounds = array<i64: 1, 4, 8, 8>}, {transform_indices = @transform_4, window_bounds = array<i64: 1, 4, 8, 8>}, {transform_indices = @transform_5, window_bounds = array<i64: 1, 4, 8, 8>}]} {
    %c0 = arith.constant 0 : index
    %c0_0 = arith.constant 0 : index
    %c0_1 = arith.constant 0 : index
    %0 = vector.load %arg2[%c0, %c0_0, %c0_1] : memref<1x8x32xf32, #tpu.memory_space<vmem>>, vector<1x8x32xf32>
    %1 = vector.shape_cast %0 : vector<1x8x32xf32> to vector<8x32xf32>
    %c0_2 = arith.constant 0 : index
    %c0_3 = arith.constant 0 : index
    %2 = vector.load %arg3[%c0_2, %c0_3] : memref<1x32xf32, #tpu.memory_space<vmem>>, vector<1x32xf32>
    %3 = vector.shape_cast %2 : vector<1x32xf32> to vector<32xf32>
    %cst = arith.constant dense<0.000000e+00> : vector<8xf32>
    %4 = vector.multi_reduction <add>, %1, %cst [1] : vector<8x32xf32> to vector<8xf32>
    %5 = vector.shape_cast %4 : vector<8xf32> to vector<8x1xf32>
    %cst_4 = arith.constant 3.200000e+01 : f32
    %6 = vector.broadcast %cst_4 : f32 to vector<8x1xf32>
    %7 = arith.divf %5, %6 : vector<8x1xf32>
    %8 = vector.broadcast %7 : vector<8x1xf32> to vector<8x32xf32>
    %9 = arith.subf %1, %8 : vector<8x32xf32>
    %10 = arith.mulf %9, %9 : vector<8x32xf32>
    %cst_5 = arith.constant dense<0.000000e+00> : vector<8xf32>
    %11 = vector.multi_reduction <add>, %10, %cst_5 [1] : vector<8x32xf32> to vector<8xf32>
    %12 = vector.shape_cast %11 : vector<8xf32> to vector<8x1xf32>
    %cst_6 = arith.constant 3.200000e+01 : f32
    %13 = vector.broadcast %cst_6 : f32 to vector<8x1xf32>
    %14 = arith.divf %12, %13 : vector<8x1xf32>
    %15 = vector.broadcast %7 : vector<8x1xf32> to vector<8x32xf32>
    %16 = arith.subf %1, %15 : vector<8x32xf32>
    %cst_7 = arith.constant 9.99999974E-6 : f32
    %17 = vector.broadcast %cst_7 : f32 to vector<8x1xf32>
    %18 = arith.addf %14, %17 : vector<8x1xf32>
    %19 = math.rsqrt %18 : vector<8x1xf32>
    %20 = vector.broadcast %19 : vector<8x1xf32> to vector<8x32xf32>
    %21 = arith.mulf %16, %20 : vector<8x32xf32>
    %22 = vector.shape_cast %3 : vector<32xf32> to vector<1x32xf32>
    %23 = vector.broadcast %22 : vector<1x32xf32> to vector<8x32xf32>
    %24 = arith.mulf %21, %23 : vector<8x32xf32>
    %25 = arith.truncf %24 : vector<8x32xf32> to vector<8x32xbf16>
    %c0_8 = arith.constant 0 : index
    %c0_9 = arith.constant 0 : index
    %26 = vector.load %arg4[%c0_8, %c0_9] : memref<32x96xbf16, #tpu.memory_space<vmem>>, vector<32x96xbf16>
    %cst_10 = arith.constant dense<0.000000e+00> : vector<8x96xf32>
    %27 = tpu.matmul %25, %26, %cst_10 {dimension_numbers = #tpu.dot_dimension_numbers<[1], [0], [0], [1], [0, 0, 1, 1], [], []>} : vector<8x32xbf16>, vector<32x96xbf16>, vector<8x96xf32> -> vector<8x96xf32>
    %28 = arith.truncf %27 : vector<8x96xf32> to vector<8x96xbf16>
    %29 = vector.extract_strided_slice %28 {offsets = [0, 0], sizes = [8, 8], strides = [1, 1]} : vector<8x96xbf16> to vector<8x8xbf16>
    %c0_11 = arith.constant 0 : index
    %c0_12 = arith.constant 0 : index
    %c0_13 = arith.constant 0 : index
    %c0_14 = arith.constant 0 : index
    %30 = vector.load %arg5[%c0_11, %c0_12, %c0_13, %c0_14] : memref<1x4x8x8xbf16, #tpu.memory_space<vmem>>, vector<1x1x8x8xbf16>
    %31 = vector.shape_cast %30 : vector<1x1x8x8xbf16> to vector<8x8xbf16>
    %32 = vector.shape_cast %29 : vector<8x8xbf16> to vector<1x1x8x8xbf16>
    tpu.vector_store %arg5[%c0_11, %c0_12, %c0_13, %c0_14], %32 {strides = array<i32>} : memref<1x4x8x8xbf16, #tpu.memory_space<vmem>>, vector<1x1x8x8xbf16>,
    %33 = vector.extract_strided_slice %28 {offsets = [0, 32], sizes = [8, 8], strides = [1, 1]} : vector<8x96xbf16> to vector<8x8xbf16>
    %c0_15 = arith.constant 0 : index
    %c0_16 = arith.constant 0 : index
    %c0_17 = arith.constant 0 : index
    %c0_18 = arith.constant 0 : index
    %34 = vector.load %arg6[%c0_15, %c0_16, %c0_17, %c0_18] : memref<1x4x8x8xbf16, #tpu.memory_space<vmem>>, vector<1x1x8x8xbf16>
    %35 = vector.shape_cast %34 : vector<1x1x8x8xbf16> to vector<8x8xbf16>
    %36 = vector.shape_cast %33 : vector<8x8xbf16> to vector<1x1x8x8xbf16>
    tpu.vector_store %arg6[%c0_15, %c0_16, %c0_17, %c0_18], %36 {strides = array<i32>} : memref<1x4x8x8xbf16, #tpu.memory_space<vmem>>, vector<1x1x8x8xbf16>,
    %37 = vector.extract_strided_slice %28 {offsets = [0, 64], sizes = [8, 8], strides = [1, 1]} : vector<8x96xbf16> to vector<8x8xbf16>
    %c0_19 = arith.constant 0 : index
    %c0_20 = arith.constant 0 : index
    %c0_21 = arith.constant 0 : index
    %c0_22 = arith.constant 0 : index
    %38 = vector.load %arg7[%c0_19, %c0_20, %c0_21, %c0_22] : memref<1x4x8x8xbf16, #tpu.memory_space<vmem>>, vector<1x1x8x8xbf16>
    %39 = vector.shape_cast %38 : vector<1x1x8x8xbf16> to vector<8x8xbf16>
    %40 = vector.shape_cast %37 : vector<8x8xbf16> to vector<1x1x8x8xbf16>
    tpu.vector_store %arg7[%c0_19, %c0_20, %c0_21, %c0_22], %40 {strides = array<i32>} : memref<1x4x8x8xbf16, #tpu.memory_space<vmem>>, vector<1x1x8x8xbf16>,
    %41 = vector.extract_strided_slice %28 {offsets = [0, 8], sizes = [8, 8], strides = [1, 1]} : vector<8x96xbf16> to vector<8x8xbf16>
    %c0_23 = arith.constant 0 : index
    %c1 = arith.constant 1 : index
    %c0_24 = arith.constant 0 : index
    %c0_25 = arith.constant 0 : index
    %42 = vector.load %arg5[%c0_23, %c1, %c0_24, %c0_25] : memref<1x4x8x8xbf16, #tpu.memory_space<vmem>>, vector<1x1x8x8xbf16>
    %43 = vector.shape_cast %42 : vector<1x1x8x8xbf16> to vector<8x8xbf16>
    %44 = vector.shape_cast %41 : vector<8x8xbf16> to vector<1x1x8x8xbf16>
    tpu.vector_store %arg5[%c0_23, %c1, %c0_24, %c0_25], %44 {strides = array<i32>} : memref<1x4x8x8xbf16, #tpu.memory_space<vmem>>, vector<1x1x8x8xbf16>,
    %45 = vector.extract_strided_slice %28 {offsets = [0, 40], sizes = [8, 8], strides = [1, 1]} : vector<8x96xbf16> to vector<8x8xbf16>
    %c0_26 = arith.constant 0 : index
    %c1_27 = arith.constant 1 : index
    %c0_28 = arith.constant 0 : index
    %c0_29 = arith.constant 0 : index
    %46 = vector.load %arg6[%c0_26, %c1_27, %c0_28, %c0_29] : memref<1x4x8x8xbf16, #tpu.memory_space<vmem>>, vector<1x1x8x8xbf16>
    %47 = vector.shape_cast %46 : vector<1x1x8x8xbf16> to vector<8x8xbf16>
    %48 = vector.shape_cast %45 : vector<8x8xbf16> to vector<1x1x8x8xbf16>
    tpu.vector_store %arg6[%c0_26, %c1_27, %c0_28, %c0_29], %48 {strides = array<i32>} : memref<1x4x8x8xbf16, #tpu.memory_space<vmem>>, vector<1x1x8x8xbf16>,
    %49 = vector.extract_strided_slice %28 {offsets = [0, 72], sizes = [8, 8], strides = [1, 1]} : vector<8x96xbf16> to vector<8x8xbf16>
    %c0_30 = arith.constant 0 : index
    %c1_31 = arith.constant 1 : index
    %c0_32 = arith.constant 0 : index
    %c0_33 = arith.constant 0 : index
    %50 = vector.load %arg7[%c0_30, %c1_31, %c0_32, %c0_33] : memref<1x4x8x8xbf16, #tpu.memory_space<vmem>>, vector<1x1x8x8xbf16>
    %51 = vector.shape_cast %50 : vector<1x1x8x8xbf16> to vector<8x8xbf16>
    %52 = vector.shape_cast %49 : vector<8x8xbf16> to vector<1x1x8x8xbf16>
    tpu.vector_store %arg7[%c0_30, %c1_31, %c0_32, %c0_33], %52 {strides = array<i32>} : memref<1x4x8x8xbf16, #tpu.memory_space<vmem>>, vector<1x1x8x8xbf16>,
    %53 = vector.extract_strided_slice %28 {offsets = [0, 16], sizes = [8, 8], strides = [1, 1]} : vector<8x96xbf16> to vector<8x8xbf16>
    %c0_34 = arith.constant 0 : index
    %c2 = arith.constant 2 : index
    %c0_35 = arith.constant 0 : index
    %c0_36 = arith.constant 0 : index
    %54 = vector.load %arg5[%c0_34, %c2, %c0_35, %c0_36] : memref<1x4x8x8xbf16, #tpu.memory_space<vmem>>, vector<1x1x8x8xbf16>
    %55 = vector.shape_cast %54 : vector<1x1x8x8xbf16> to vector<8x8xbf16>
    %56 = vector.shape_cast %53 : vector<8x8xbf16> to vector<1x1x8x8xbf16>
    tpu.vector_store %arg5[%c0_34, %c2, %c0_35, %c0_36], %56 {strides = array<i32>} : memref<1x4x8x8xbf16, #tpu.memory_space<vmem>>, vector<1x1x8x8xbf16>,
    %57 = vector.extract_strided_slice %28 {offsets = [0, 48], sizes = [8, 8], strides = [1, 1]} : vector<8x96xbf16> to vector<8x8xbf16>
    %c0_37 = arith.constant 0 : index
    %c2_38 = arith.constant 2 : index
    %c0_39 = arith.constant 0 : index
    %c0_40 = arith.constant 0 : index
    %58 = vector.load %arg6[%c0_37, %c2_38, %c0_39, %c0_40] : memref<1x4x8x8xbf16, #tpu.memory_space<vmem>>, vector<1x1x8x8xbf16>
    %59 = vector.shape_cast %58 : vector<1x1x8x8xbf16> to vector<8x8xbf16>
    %60 = vector.shape_cast %57 : vector<8x8xbf16> to vector<1x1x8x8xbf16>
    tpu.vector_store %arg6[%c0_37, %c2_38, %c0_39, %c0_40], %60 {strides = array<i32>} : memref<1x4x8x8xbf16, #tpu.memory_space<vmem>>, vector<1x1x8x8xbf16>,
    %61 = vector.extract_strided_slice %28 {offsets = [0, 80], sizes = [8, 8], strides = [1, 1]} : vector<8x96xbf16> to vector<8x8xbf16>
    %c0_41 = arith.constant 0 : index
    %c2_42 = arith.constant 2 : index
    %c0_43 = arith.constant 0 : index
    %c0_44 = arith.constant 0 : index
    %62 = vector.load %arg7[%c0_41, %c2_42, %c0_43, %c0_44] : memref<1x4x8x8xbf16, #tpu.memory_space<vmem>>, vector<1x1x8x8xbf16>
    %63 = vector.shape_cast %62 : vector<1x1x8x8xbf16> to vector<8x8xbf16>
    %64 = vector.shape_cast %61 : vector<8x8xbf16> to vector<1x1x8x8xbf16>
    tpu.vector_store %arg7[%c0_41, %c2_42, %c0_43, %c0_44], %64 {strides = array<i32>} : memref<1x4x8x8xbf16, #tpu.memory_space<vmem>>, vector<1x1x8x8xbf16>,
    %65 = vector.extract_strided_slice %28 {offsets = [0, 24], sizes = [8, 8], strides = [1, 1]} : vector<8x96xbf16> to vector<8x8xbf16>
    %c0_45 = arith.constant 0 : index
    %c3 = arith.constant 3 : index
    %c0_46 = arith.constant 0 : index
    %c0_47 = arith.constant 0 : index
    %66 = vector.load %arg5[%c0_45, %c3, %c0_46, %c0_47] : memref<1x4x8x8xbf16, #tpu.memory_space<vmem>>, vector<1x1x8x8xbf16>
    %67 = vector.shape_cast %66 : vector<1x1x8x8xbf16> to vector<8x8xbf16>
    %68 = vector.shape_cast %65 : vector<8x8xbf16> to vector<1x1x8x8xbf16>
    tpu.vector_store %arg5[%c0_45, %c3, %c0_46, %c0_47], %68 {strides = array<i32>} : memref<1x4x8x8xbf16, #tpu.memory_space<vmem>>, vector<1x1x8x8xbf16>,
    %69 = vector.extract_strided_slice %28 {offsets = [0, 56], sizes = [8, 8], strides = [1, 1]} : vector<8x96xbf16> to vector<8x8xbf16>
    %c0_48 = arith.constant 0 : index
    %c3_49 = arith.constant 3 : index
    %c0_50 = arith.constant 0 : index
    %c0_51 = arith.constant 0 : index
    %70 = vector.load %arg6[%c0_48, %c3_49, %c0_50, %c0_51] : memref<1x4x8x8xbf16, #tpu.memory_space<vmem>>, vector<1x1x8x8xbf16>
    %71 = vector.shape_cast %70 : vector<1x1x8x8xbf16> to vector<8x8xbf16>
    %72 = vector.shape_cast %69 : vector<8x8xbf16> to vector<1x1x8x8xbf16>
    tpu.vector_store %arg6[%c0_48, %c3_49, %c0_50, %c0_51], %72 {strides = array<i32>} : memref<1x4x8x8xbf16, #tpu.memory_space<vmem>>, vector<1x1x8x8xbf16>,
    %73 = vector.extract_strided_slice %28 {offsets = [0, 88], sizes = [8, 8], strides = [1, 1]} : vector<8x96xbf16> to vector<8x8xbf16>
    %c0_52 = arith.constant 0 : index
    %c3_53 = arith.constant 3 : index
    %c0_54 = arith.constant 0 : index
    %c0_55 = arith.constant 0 : index
    %74 = vector.load %arg7[%c0_52, %c3_53, %c0_54, %c0_55] : memref<1x4x8x8xbf16, #tpu.memory_space<vmem>>, vector<1x1x8x8xbf16>
    %75 = vector.shape_cast %74 : vector<1x1x8x8xbf16> to vector<8x8xbf16>
    %76 = vector.shape_cast %73 : vector<8x8xbf16> to vector<1x1x8x8xbf16>
    tpu.vector_store %arg7[%c0_52, %c3_53, %c0_54, %c0_55], %76 {strides = array<i32>} : memref<1x4x8x8xbf16, #tpu.memory_space<vmem>>, vector<1x1x8x8xbf16>,
    return
  }
  func.func @transform_0(%arg0: i32, %arg1: i32) -> (i32, i32, i32) {
    %c0_i32 = arith.constant 0 : i32
    %c0_i32_0 = arith.constant 0 : i32
    return %arg0, %arg1, %c0_i32 : i32, i32, i32
  }
  func.func @transform_1(%arg0: i32, %arg1: i32) -> (i32, i32) {
    %c0_i32 = arith.constant 0 : i32
    %c0_i32_0 = arith.constant 0 : i32
    %c0_i32_1 = arith.constant 0 : i32
    return %c0_i32, %c0_i32_0 : i32, i32
  }
  func.func @transform_2(%arg0: i32, %arg1: i32) -> (i32, i32) {
    %c0_i32 = arith.constant 0 : i32
    %c0_i32_0 = arith.constant 0 : i32
    %c0_i32_1 = arith.constant 0 : i32
    return %c0_i32, %c0_i32_0 : i32, i32
  }
  func.func @transform_3(%arg0: i32, %arg1: i32) -> (i32, i32, i32, i32) {
    %c0_i32 = arith.constant 0 : i32
    %c0_i32_0 = arith.constant 0 : i32
    %c0_i32_1 = arith.constant 0 : i32
    return %arg0, %c0_i32, %arg1, %c0_i32_0 : i32, i32, i32, i32
  }
  func.func @transform_4(%arg0: i32, %arg1: i32) -> (i32, i32, i32, i32) {
    %c0_i32 = arith.constant 0 : i32
    %c0_i32_0 = arith.constant 0 : i32
    %c0_i32_1 = arith.constant 0 : i32
    return %arg0, %c0_i32, %arg1, %c0_i32_0 : i32, i32, i32, i32
  }
  func.func @transform_5(%arg0: i32, %arg1: i32) -> (i32, i32, i32, i32) {
    %c0_i32 = arith.constant 0 : i32
    %c0_i32_0 = arith.constant 0 : i32
    %c0_i32_1 = arith.constant 0 : i32
    return %arg0, %c0_i32, %arg1, %c0_i32_0 : i32, i32, i32, i32
  }
}

</mosaic_0001>

<bundles_post_ra>
// kernel: tpu_custom_call.1
= control target key start
LH: loop header
LB: loop body
LE: loop exit
PB: predicated region body
PF: predicated region fallthrough
CT: control target
= control target key end

     0   :  { %11 = vsyncpa [#allocation3], 0  ;;  %s1399_s0 = inlined_call_operand.hbm [shape: f32[2,8,32], index: 0, kind: input, shape index: {}]   ;;  %s1400_s1 = inlined_call_operand.vmem [shape: f32[1,32], index: 1, kind: input, shape index: {}]   ;;  %s1401_s2 = inlined_call_operand.hbm [shape: bf16[32,96], index: 2, kind: input, shape index: {}]   ;;  %s1402_s3 = inlined_call_operand.hbm [shape: bf16[2,4,8,8], index: 3, kind: output, shape index: {0}]   ;;  %s1403_s4 = inlined_call_operand.hbm [shape: bf16[2,4,8,8], index: 4, kind: output, shape index: {1}]   ;;  %s1404_s5 = inlined_call_operand.hbm [shape: bf16[2,4,8,8], index: 5, kind: output, shape index: {2}]  }
   0x1   :  { %13 = vsyncpa [#allocation3 + $0x1], 0 }
   0x2   :  { %14 = vsyncpa [#allocation6], 0 }
   0x3   :  { %15 = vsyncpa [#allocation4], 0 }
   0x4   :  { %17 = vsyncpa [#allocation4 + $0x1], 0 }
   0x5   :  { %18 = vsyncpa [#allocation9], 0 }
   0x6   :  { %20 = vsyncpa [#allocation9 + $0x1], 0  ;;  %s1069_s18 = smov 0   ;;  %s1071_s19 = smov 0  }
   0x7   :  { %s1073_s20 = smov 0   ;;  %s1075_s21 = smov 0  }
   0x8   :  { %s1077_s22 = smov 0   ;;  %s1079_s23 = smov 0  }
   0x9 LB: > { %s1100_s24 = sadd.s32 4294967295, %s1016_s23   ;;  %s1408_s25 = sadd.s32 4294967294, %s1016_s23   ;;  %s1016_s23 = sphi %s1079_s23, %s26_s23   ;;  %s1012_s22 = sphi %s1077_s22, %s1429_s22   ;;  %s1008_s21 = sphi %s1075_s21, %s1428_s21   ;;  %s1004_s20 = sphi %s1073_s20, %s1427_s20   ;;  %s1000_s19 = sphi %s1071_s19, %s1426_s19   ;;  %s996_s18 = sphi %s1069_s18, %s1425_s18  }
   0xa   : > { %p60_p0 = scmp.ne.s32.totalorder %s1000_s19, %s996_s18  ;;  %p1405_p1 = scmp.eq.s32.totalorder %s1100_s24, 0 }
   0xb   : > { %p134_p3 = scmp.eq.s32.totalorder %s1408_s25, 1  ;;  %p658_p5 = scmp.ge.s32.totalorder %s1016_s23, 1 }
   0xc   : > { %p1111_p4 = por %p1405_p1, %p60_p0  ;;  %p197_p7 = scmp.lt.s32.totalorder %s1016_s23, 3 }
   0xd   : > { %p1116_p6 = por %p134_p3, %p60_p0  ;;  %s1018_s29 = smov [#allocation5]  }
   0xe   : > { %s1409_s26 = scalar_select %p1111_p4, 1, 0 }
   0xf   : > { %s1410_s27 = scalar_select %p1116_p6, 1, 0 }
  0x10   : > { %p1121_p8 = pnand %p658_p5, %p197_p7  ;;  %s212_s30 = sshll.u32 %s1018_s29, 4  ;;  %s213_s30 = int_to_ptr.vmem [resolvable:$true] %s212_s30 }
  0x11   : > { %s38_s7 = sadd.s32 1, %s1012_s22  ;;  %s812_s10 = scalar_lea.hbm %s1401_s2, 256 }
  0x12   : > { %s1411_s28 = scalar_select %p1121_p8, 1, 0 }
  0x13   : > { %p721_p9 = pneg %p1121_p8  ;;  %p813_p12 = scmp.ne.s32.totalorder %s1401_s2, %s812_s10 }
  0x14   : > { %p819_p5 = scmp.lt.u32.totalorder %s812_s10, %s1401_s2 }
  0x15   : > { %p1130_p11 = pnand %p721_p9, %p1405_p1 }
  0x17   : > { %p814_p13 = pneg %p1130_p11 }
  0x19   : > { %p815_p0 = pnand %p814_p13, %p813_p12 }
  0x1b   : > { %p816_p3 = pneg %p815_p0 }
  0x1d   : > { %p821_p7 = pnand %p819_p5, %p816_p3 }
  0x1f   : > { %824 = shalt.err (!%p821_p7)
}
  0x20   : > { %s825_s15 = scalar_lea.vmem %s213_s30, 256  ;;  %p833_p2 = scmp.lt.s32.totalorder %s213_s30, %s213_s30 }
  0x21   : > { %p826_p9 = scmp.ne.s32.totalorder %s213_s30, %s825_s15  ;;  %p834_p6 = scmp.lt.s32.totalorder %s825_s15, %s825_s15 }
  0x23   : > { %p828_p10 = pnand %p826_p9, %p814_p13  ;;  %p835_p4 = por %p834_p6, %p833_p2 }
  0x25   : > { %p829_p1 = pneg %p828_p10 }
  0x27   : > { %p836_p8 = pnand %p835_p4, %p829_p1 }
  0x29   : > { %839 = shalt.err (!%p836_p8)
}
  0x2a   : > { %s1019_s16 = smov 64   ;;  %s1020_s17 = smov 4  }
  0x2b   : > { %724 = dma.hbm_to_vmem [thread:$0]  (!%p1130_p11), %s1401_s2, 256, %s213_s30, [#allocation6], %s1019_s16, %s1019_s16, %s1020_s17  }
  0x2c   : > { %p40_p1 = scmp.ge.s32.totalorder %s38_s7, 2  ;;  %s47_s9 = sadd.s32 1, %s1004_s20 }
  0x2d   : > { %p54_p2 = scmp.ne.s32.totalorder %s1004_s20, %s1000_s19  ;;  %p55_p4 = scmp.eq.s32.totalorder %s1016_s23, 0 }
  0x2e   : > { %s1431_s7 = smov (%p40_p1, %s38_s7), 0  ;;  %p1414_p8 = scmp.eq.s32.totalorder %s1100_s24, 1 }
  0x2f   : > { %p1157_p6 = por %p55_p4, %p54_p2  ;;  %s42_s6 = ssub.s32 %s1012_s22, %s1431_s7 }
  0x30   : > { %p1163_p10 = por %p1414_p8, %p54_p2  ;;  %p740_p12 = scmp.lt.s32.totalorder %s1016_s23, 2 }
  0x31   : > { %p45_p11 = scmp.eq.s32.totalorder %s42_s6, 0  ;;  %s226_s30 = sand.u32 1, %s1004_s20  }
  0x32   : > { %s661_s12 = sshll.u32 %s226_s30, 3  ;;  %s662_s14 = sshll.u32 %s1012_s22, 7 }
  0x33   : > { %s1172_s13 = scalar_select %p45_p11, %s1004_s20, %s47_s9  }
  0x34   : > { %s1178_s17 = scalar_lea.hbm %s1399_s0, %s662_s14  ;;  %s230_s29 = scalar_lea.vmem [#allocation2], %s661_s12 }
  0x35   : > { %s238_s8 = sshll.u32 %s230_s29, 4  ;;  %p1184_p13 = pnand %p740_p12, %p1157_p6  ;;  %s1180_s8 = int_to_ptr.vmem [resolvable:$true] %s238_s8 }
  0x36   : > { %s227_s9 = scalar_lea.sflag [#allocation3], %s226_s30  ;;  %s840_s25 = scalar_lea.hbm %s1178_s17, 128 }
  0x37   : > { %p841_p0 = scmp.ne.s32.totalorder %s1178_s17, %s840_s25  ;;  %p842_p3 = pneg %p1184_p13 }
  0x38   : > { %s845_s15 = scalar_lea.hbm %s1399_s0, 256  ;;  %p846_p9 = scmp.lt.u32.totalorder %s1178_s17, %s1399_s0 }
  0x39   : > { %p843_p5 = pnand %p842_p3, %p841_p0  ;;  %p847_p1 = scmp.lt.u32.totalorder %s845_s15, %s840_s25 }
  0x3a   : > { %p849_p4 = scmp.lt.u32.totalorder %s840_s25, %s1178_s17 }
  0x3b   : > { %p844_p7 = pneg %p843_p5  ;;  %p848_p2 = por %p847_p1, %p846_p9 }
  0x3d   : > { %p850_p6 = por %p849_p4, %p848_p2 }
  0x3f   : > { %p851_p8 = pnand %p850_p6, %p844_p7 }
  0x41   : > { %854 = shalt.err (!%p851_p8)
}
  0x42   : > { %s855_s30 = scalar_lea.vmem %s1180_s8, 128  ;;  %s1021_s29 = smov [#allocation2]  }
  0x43   : > { %p856_p12 = scmp.ne.s32.totalorder %s1180_s8, %s855_s30  ;;  %s860_s12 = sshll.u32 %s1021_s29, 4  ;;  %s861_s12 = int_to_ptr.vmem [resolvable:$false] %s860_s12 }
  0x44   : > { %s862_s14 = scalar_lea.vmem %s861_s12, 256  ;;  %p863_p5 = scmp.lt.s32.totalorder %s1180_s8, %s861_s12 }
  0x45   : > { %p858_p11 = pnand %p856_p12, %p842_p3  ;;  %p864_p9 = scmp.lt.s32.totalorder %s862_s14, %s855_s30 }
  0x47   : > { %p859_p0 = pneg %p858_p11  ;;  %p865_p1 = por %p864_p9, %p863_p5 }
  0x49   : > { %p866_p2 = pnand %p865_p1, %p859_p0 }
  0x4b   : > { %869 = shalt.err (!%p866_p2)
}
  0x4c   : > { %728 = dma.hbm_to_vmem [thread:$0]  (!%p1184_p13), %s1178_s17, 128, %s1180_s8, %s227_s9  }
  0x4d   : > { %p1417_p7 = scmp.ne.s32.totalorder %s1411_s28, 0 }
  0x4e   : > { %s1216_s25 = sand.u32 (!%p1417_p7), 1, %s1000_s19   ;;  %p1418_p3 = scmp.ne.s32.totalorder (!%p1417_p7), %s1409_s26, 0 }
  0x4f   : > { %247 = sbr.rel (%p1417_p7) target bundleno = 805 (0x325), region = 32  ;;  %s664_s15 = sshll.u32 (!%p1417_p7), %s1216_s25, 3 }
  0x50   : > { %s250_s10 = scalar_lea.sflag (!%p1417_p7), [#allocation3], %s1216_s25  ;;  %s253_s16 = scalar_lea.vmem (!%p1417_p7), [#allocation2], %s664_s15 }
  0x56   : > { %979 = dma.done.wait (%p1418_p3), %s250_s10, 128  }
  0x57   : > { %981 = vsyncadd (%p1418_p3), %s250_s10, 4294967168  ;;  %p1419_p4 = scmp.eq.s32.totalorder %s1100_s24, 0 }
  0x59   : > { %983 = dma.done.wait (%p1419_p4), [#allocation6], 256   ;;  %p1420_p13 = pmov %p1419_p4 }
  0x5a   : > { %vm297_vm0 = vcmask 261120   ;;  %v295_v0 = vld [vmem:[%s253_s16] sm:$0xff]  ;;  %v808_v7 = vld [vmem:[#allocation5] sm:$0xff]   ;;  %v1022_v8 = vmov 0.0   ;;  %vm1023_vm1 = vmmov 0   ;;  %v809_v9 = vld [vmem:[#allocation5 + $0x8] sm:$0xff]  }
  0x5b   : > { %985 = vsyncadd (%p1420_p13), [#allocation6], 4294967040  ;;  %v298_v1 = vsel %vm297_vm0, %v295_v0, 0.0  ;;  %701 = vmatprep.subr.bf16.mxu0 %v1022_v8  ;;  %705 = vmatprep.mubr.msk.bf16.mxu0 %vm1023_vm1, %v1022_v8  ;;  %v669_v14 = vld [vmem:[%s1400_s1] ss:$0 sm:$0xff]  ;;  %s1235_s17 = sshll.u32 %s1216_s25, 4 }
  0x5c   : > { %299 = vadd.xlane.f32.xlu0 %v298_v1  ;;  %702 = vmatpush3.bf16.msra.mxu0 %v808_v7  ;;  %vm380_vm2 = vcmask 60416   ;;  %s1024_s8 = smov 80   ;;  %s1025_s6 = smov 96  }
  0x5d   : > { %703 = vmatprep.subr.bf16.mxu0 %v1022_v8  ;;  %s1238_s9 = scalar_lea.vmem [#allocation7], %s1235_s17  ;;  %s1026_s30 = smov 104  }
  0x5e   : > { %s1027_s29 = smov 88   ;;  %s1028_s12 = smov 72  }
  0x5f   : > { %s1029_s14 = smov 64   ;;  %s1030_s15 = smov 120  }
  0x60   : > { %704 = vmatpush3.bf16.msra.mxu0 %v809_v9  ;;  %s1031_s10 = smov 56   ;;  %s1032_s16 = smov 112  }
  0x61   : > { %s1033_s26 = smov 48   ;;  %s1034_s28 = smov 40  }
  0xe9   : > { %v300_v2 = vpop.xlane.xlu0 %299 }
  0xea   : > { %v302_v3 = vmul.f32 0.03125, %v300_v2 }
  0xec   : > { %v303_v4 = vsub.f32 %v295_v0, %v302_v3 }
  0xee   : > { %v304_v5 = vmul.f32 %v303_v4, %v303_v4 }
  0xf0   : > { %v305_v6 = vsel %vm297_vm0, %v304_v5, 0.0 }
  0xf1   : > { %306 = vadd.xlane.f32.xlu0 %v305_v6 }
 0x17e   : > { %v307_v10 = vpop.xlane.xlu0 %306 }
 0x17f   : > { %v308_v11 = vmul.f32 0.03125, %v307_v10 }
 0x181   : > { %v309_v12 = vadd.f32 1e-05, %v308_v11 }
 0x183   : > { %810 = vrsqrt.f32 %v309_v12 }
 0x18d   : > { %v811_v13 = vpop.eup %810 }
 0x18e   : > { %v311_v15 = vmul.f32 %v811_v13, %v303_v4 }
 0x190   : > { %v318_v16 = vmul.f32 %v669_v14, %v311_v15 }
 0x192   : > { %v319_v17 = vpack.c.bf16 %v318_v16, %v318_v16 }
 0x194   : > { %706 = vmatmul.mubr.msk.bf16.vlgmr.msra.gmra.mrb[0].mxu0 %vm297_vm0, %v319_v17 }
 0x267   : > { %v373_v18 = vpop.f32.mrb[0].mxu0 }
 0x268   : > { %v379_v19 = vpack.c.bf16 %v373_v18, %v373_v18  ;;  %v707_v20 = vpop.f32.mrb[1].mxu0 }
 0x269   : > { %v376_v21 = vpop.f32.mrb[2].mxu0 }
 0x26a   : > { %413 = vrot.lane.b32.xlu0 %v379_v19, %s1024_s8  ;;  %385 = vrot.lane.b32.xlu1 %v379_v19, %s1025_s6  ;;  %v708_v22 = vpop.f32.mrb[3].mxu0  ;;  %381 = vst.msk [vmem:[%s1238_s9] sm:$0xf] %vm380_vm2, %v379_v19  ;;  %s286_s8 = scalar_lea.vmem [#allocation8], %s1235_s17 }
 0x26b   : > { %s480_s6 = sshll.u32 %s286_s8, 4  ;;  %s1253_s6 = int_to_ptr.vmem [resolvable:$true] %s480_s6 }
 0x26e   : > { %423 = vrot.lane.b32.xlu0 %v379_v19, %s1026_s30  ;;  %398 = vrot.lane.b32.xlu1 %v379_v19, %s1027_s29  ;;  %s443_s30 = sand.u32 1, %s1100_s24   ;;  %s1248_s29 = sshll.u32 %s1008_s21, 8 }
 0x26f   : > { %s1262_s21 = scalar_lea.sflag [#allocation9], %s443_s30  ;;  %s870_s24 = scalar_lea.vmem %s1253_s6, 256 }
 0x270   : > { %p871_p6 = scmp.ne.s32.totalorder %s1253_s6, %s870_s24 }
 0x272   : > { %428 = vrot.lane.b32.xlu1 %v379_v19, %s1028_s12  ;;  %p872_p8 = pnand %p871_p6, %p1163_p10 }
 0x274   : > { %p873_p12 = pneg %p872_p8 }
 0x276   : > { %389 = vrot.lane.b32.xlu1 %v379_v19, %s1029_s14 }
 0x27a   : > { %393 = vrot.lane.b32.xlu1 %v379_v19, %s1030_s15 }
 0x27e   : > { %403 = vrot.lane.b32.xlu1 %v379_v19, %s1031_s10  ;;  %s1259_s10 = scalar_lea.hbm %s1403_s4, %s1248_s29 }
 0x282   : > { %408 = vrot.lane.b32.xlu1 %v379_v19, %s1032_s16  ;;  %s1035_s16 = smov [#allocation8]  }
 0x286   : > { %418 = vrot.lane.b32.xlu1 %v379_v19, %s1033_s26  ;;  %s874_s26 = sshll.u32 %s1035_s16, 4  ;;  %s875_s26 = int_to_ptr.vmem [resolvable:$false] %s874_s26 }
 0x287   : > { %p877_p11 = scmp.lt.s32.totalorder %s1253_s6, %s875_s26 }
 0x28a   : > { %433 = vrot.lane.b32.xlu1 %v379_v19, %s1034_s28  ;;  %s876_s28 = scalar_lea.vmem %s875_s26, 512 }
 0x28b   : > { %p878_p0 = scmp.lt.s32.totalorder %s876_s28, %s870_s24 }
 0x28d   : > { %p879_p5 = por %p878_p0, %p877_p11 }
 0x28f   : > { %p880_p9 = pnand %p879_p5, %p873_p12 }
 0x2dc   : > { %v414_v23 = vpop.permute.xlu0 %413  ;;  %v386_v24 = vpop.permute.xlu1 %385 }
 0x2dd   : > { %678 = vst.msk [vmem:[%s286_s8 + $0x8] sm:$0xf] %vm380_vm2, %v414_v23  ;;  %388 = vst.msk [vmem:[%s286_s8] sm:$0xf] %vm380_vm2, %v386_v24 }
 0x2e0   : > { %v424_v25 = vpop.permute.xlu0 %423  ;;  %v399_v26 = vpop.permute.xlu1 %398 }
 0x2e1   : > { %680 = vst.msk [vmem:[%s1238_s9 + $0xc] sm:$0xf] %vm380_vm2, %v424_v25  ;;  %675 = vst.msk [vmem:[%s286_s8 + $0x4] sm:$0xf] %vm380_vm2, %v399_v26 }
 0x2e4   : > { %v429_v27 = vpop.permute.xlu1 %428 }
 0x2e5   : > { %681 = vst.msk [vmem:[%s286_s8 + $0xc] sm:$0xf] %vm380_vm2, %v429_v27 }
 0x2e6   : > { %883 = shalt.err (!%p880_p9)
}
 0x2e7   : > { %s884_s8 = scalar_lea.hbm %s1259_s10, 256  ;;  %s888_s15 = scalar_lea.hbm %s1403_s4, 512 }
 0x2e8   : > { %p885_p1 = scmp.ne.s32.totalorder %s1259_s10, %s884_s8  ;;  %p889_p3 = scmp.lt.u32.totalorder %s1259_s10, %s1403_s4 }
 0x2e9   : > { %p890_p4 = scmp.lt.u32.totalorder %s888_s15, %s884_s8  ;;  %p892_p6 = scmp.lt.u32.totalorder %s884_s8, %s1259_s10 }
 0x2ea   : > { %p886_p2 = pnand %p885_p1, %p1163_p10 }
 0x2eb   : > { %p891_p13 = por %p890_p4, %p889_p3 }
 0x2ec   : > { %p887_p7 = pneg %p886_p2 }
 0x2ed   : > { %p893_p8 = por %p892_p6, %p891_p13 }
 0x2ef   : > { %p894_p12 = pnand %p893_p8, %p887_p7 }
 0x2f1   : > { %897 = shalt.err (!%p894_p12)
}
 0x2f2   : > { %s1036_s24 = smov 4   ;;  %v390_v28 = vpop.permute.xlu1 %389  ;;  %s1290_s28 = scalar_lea.vmem [#allocation10], %s1235_s17 }
 0x2f3   : > { %716 = dma.vmem_to_hbm [thread:$0]  (%p1163_p10), %s1253_s6, 256, %s1259_s10, %s1262_s21, %s1029_s14, %s1029_s14, %s1036_s24  }
 0x2f4   : > { %392 = vst.msk [vmem:[%s1290_s28] sm:$0xf] %vm380_vm2, %v390_v28  ;;  %s463_s8 = sshll.u32 %s1238_s9, 4  ;;  %s1305_s17 = scalar_lea.hbm %s1402_s3, %s1248_s29  ;;  %s1299_s8 = int_to_ptr.vmem [resolvable:$true] %s463_s8 }
 0x2f5   : > { %s898_s10 = scalar_lea.vmem %s1299_s8, 256  ;;  %s1037_s15 = smov [#allocation7]  }
 0x2f6   : > { %v394_v29 = vpop.permute.xlu1 %393  ;;  %p899_p11 = scmp.ne.s32.totalorder %s1299_s8, %s898_s10  ;;  %s902_s16 = sshll.u32 %s1037_s15, 4  ;;  %s903_s16 = int_to_ptr.vmem [resolvable:$false] %s902_s16 }
 0x2f7   : > { %674 = vst.msk [vmem:[%s1238_s9 + $0x4] sm:$0xf] %vm380_vm2, %v394_v29  ;;  %s904_s26 = scalar_lea.vmem %s903_s16, 512  ;;  %p905_p9 = scmp.lt.s32.totalorder %s1299_s8, %s903_s16 }
 0x2f8   : > { %p900_p0 = pnand %p899_p11, %p1163_p10  ;;  %p906_p1 = scmp.lt.s32.totalorder %s904_s26, %s898_s10 }
 0x2fa   : > { %v404_v30 = vpop.permute.xlu1 %403  ;;  %p901_p5 = pneg %p900_p0  ;;  %p907_p2 = por %p906_p1, %p905_p9 }
 0x2fb   : > { %676 = vst.msk [vmem:[%s1290_s28 + $0x4] sm:$0xf] %vm380_vm2, %v404_v30 }
 0x2fc   : > { %p908_p7 = pnand %p907_p2, %p901_p5 }
 0x2fe   : > { %v409_v31 = vpop.permute.xlu1 %408 }
 0x2ff   : > { %677 = vst.msk [vmem:[%s1238_s9 + $0x8] sm:$0xf] %vm380_vm2, %v409_v31 }
 0x300   : > { %911 = shalt.err (!%p908_p7)
}
 0x301   : > { %s912_s9 = scalar_lea.hbm %s1305_s17, 256  ;;  %s916_s15 = scalar_lea.hbm %s1402_s3, 512 }
 0x302   : > { %p913_p3 = scmp.ne.s32.totalorder %s1305_s17, %s912_s9  ;;  %p917_p6 = scmp.lt.u32.totalorder %s1305_s17, %s1402_s3 }
 0x303   : > { %p918_p8 = scmp.lt.u32.totalorder %s916_s15, %s912_s9  ;;  %p920_p11 = scmp.lt.u32.totalorder %s912_s9, %s1305_s17 }
 0x304   : > { %p914_p4 = pnand %p913_p3, %p1163_p10 }
 0x305   : > { %p919_p12 = por %p918_p8, %p917_p6 }
 0x306   : > { %p915_p13 = pneg %p914_p4 }
 0x307   : > { %p921_p0 = por %p920_p11, %p919_p12 }
 0x309   : > { %p922_p5 = pnand %p921_p0, %p915_p13 }
 0x30b   : > { %925 = shalt.err (!%p922_p5)
}
 0x30c   : > { %s1421_s10 = scalar_lea.sflag [#allocation4], %s1216_s25  ;;  %s497_s6 = sshll.u32 %s1290_s28, 4  ;;  %v419_v32 = vpop.permute.xlu1 %418  ;;  %s1339_s6 = int_to_ptr.vmem [resolvable:$true] %s497_s6 }
 0x30d   : > { %715 = dma.vmem_to_hbm [thread:$0]  (%p1163_p10), %s1299_s8, 256, %s1305_s17, %s1421_s10, %s1029_s14, %s1029_s14, %s1036_s24  }
 0x30e   : > { %679 = vst.msk [vmem:[%s1290_s28 + $0x8] sm:$0xf] %vm380_vm2, %v419_v32  ;;  %s1345_s25 = scalar_lea.hbm %s1404_s5, %s1248_s29  ;;  %s926_s30 = scalar_lea.vmem %s1339_s6, 256 }
 0x30f   : > { %p927_p9 = scmp.ne.s32.totalorder %s1339_s6, %s926_s30  ;;  %s1038_s8 = smov [#allocation10]  }
 0x310   : > { %v434_v33 = vpop.permute.xlu1 %433  ;;  %s930_s17 = sshll.u32 %s1038_s8, 4  ;;  %s931_s17 = int_to_ptr.vmem [resolvable:$false] %s930_s17 }
 0x311   : > { %682 = vst.msk [vmem:[%s1290_s28 + $0xc] sm:$0xf] %vm380_vm2, %v434_v33  ;;  %p928_p1 = pnand %p927_p9, %p1163_p10  ;;  %s932_s12 = scalar_lea.vmem %s931_s17, 512 }
 0x312   : > { %p933_p7 = scmp.lt.s32.totalorder %s1339_s6, %s931_s17  ;;  %p934_p3 = scmp.lt.s32.totalorder %s932_s12, %s926_s30 }
 0x313   : > { %p929_p2 = pneg %p928_p1 }
 0x314   : > { %p935_p4 = por %p934_p3, %p933_p7 }
 0x316   : > { %p936_p13 = pnand %p935_p4, %p929_p2 }
 0x318   : > { %939 = shalt.err (!%p936_p13)
}
 0x319   : > { %s940_s29 = scalar_lea.hbm %s1345_s25, 256  ;;  %s944_s16 = scalar_lea.hbm %s1404_s5, 512 }
 0x31a   : > { %p941_p6 = scmp.ne.s32.totalorder %s1345_s25, %s940_s29  ;;  %p945_p11 = scmp.lt.u32.totalorder %s1345_s25, %s1404_s5 }
 0x31b   : > { %p946_p0 = scmp.lt.u32.totalorder %s944_s16, %s940_s29  ;;  %p948_p9 = scmp.lt.u32.totalorder %s940_s29, %s1345_s25 }
 0x31c   : > { %p942_p8 = pnand %p941_p6, %p1163_p10 }
 0x31d   : > { %p947_p5 = por %p946_p0, %p945_p11 }
 0x31e   : > { %p943_p12 = pneg %p942_p8 }
 0x31f   : > { %p949_p1 = por %p948_p9, %p947_p5 }
 0x321   : > { %p950_p2 = pnand %p949_p1, %p943_p12 }
 0x323   : > { %953 = shalt.err (!%p950_p2)
}
 0x324   : > { %717 = dma.vmem_to_hbm [thread:$0]  (%p1163_p10), %s1339_s6, 256, %s1345_s25, %s1262_s21, %s1029_s14, %s1029_s14, %s1036_s24  }
 0x325 PF: > { %s512_s9 = sand.u32 1, %s996_s18   ;;  %p1422_p7 = scmp.ne.s32.totalorder %s1410_s27, 0 }
 0x326   : > { %p1423_p3 = scmp.ge.s32.totalorder %s1016_s23, 2  ;;  %s513_s30 = scalar_lea.sflag [#allocation4], %s512_s9 }
 0x328   : > { %p730_p4 = pnand %p1423_p3, %p1422_p7 }
 0x32a   : > { %987 = dma.done.wait (!%p730_p4), %s513_s30, 256  }
 0x32b   : > { %989 = vsyncadd (!%p730_p4), %s513_s30, 4294967040  ;;  %s1424_s11 = sadd.s32 4294967294, %s1016_s23  }
 0x32c   : > { %s521_s8 = sand.u32 1, %s1424_s11  }
 0x32d   : > { %s522_s17 = scalar_lea.sflag [#allocation9], %s521_s8 }
 0x32e   : > { %991 = dma.done.wait (!%p730_p4), %s522_s17, 512  }
 0x32f   : > { %993 = vsyncadd (!%p730_p4), %s522_s17, 4294966784  ;;  %s26_s23 = sadd.s32 1, %s1016_s23   ;;  %s1425_s18 = smov %s1000_s19 }
 0x330   : > { %p23_p10 = scmp.ge.s32.totalorder %s26_s23, 4   ;;  %s1426_s19 = smov %s1004_s20 }
 0x331   : > { %s1427_s20 = smov %s1172_s13  ;;  %s1428_s21 = smov %s1012_s22 }
 0x332   : > { %s1429_s22 = smov %s1431_s7  ;;  %25 = sbr.rel (!%p23_p10) target bundleno = 9 (0x9), region = 122 }
 0x339   :  { %536 = vsyncpa [#allocation3], 1 }
 0x33a   :  { %538 = vsyncpa [#allocation3 + $0x1], 1 }
 0x33b   :  { %539 = vsyncpa [#allocation6], 1 }
 0x33c   :  { %540 = vsyncpa [#allocation4], 1 }
 0x33d   :  { %542 = vsyncpa [#allocation4 + $0x1], 1 }
 0x33e   :  { %543 = vsyncpa [#allocation9], 1 }
 0x33f   :  { %545 = vsyncpa [#allocation9 + $0x1], 1 }

</bundles_post_ra>
